<compile_context>
chip_gen: v7x
topology: tpu7x:2x2x1
jax: 0.10.0
libtpu: 0.0.40
codegen_flags: <defaults>
</compile_context>

<pallas_src>
import functools

import jax
import jax.numpy as jnp
from jax.experimental import pallas as pl
from jax.experimental.pallas import tpu as pltpu


# --------------------------- fused residual kernel ---------------------------

def _fused_residual_kernel(x_ref, g_ref, b_ref, w_ref, wb_ref, rnd_ref, o_ref,
                           *, eps, p, apply_dropout):
    x = x_ref[...].astype(jnp.float32)                          # (TR, D)

    # LayerNorm over the last (lane) dim.
    mean = jnp.mean(x, axis=-1, keepdims=True)
    var = jnp.mean((x - mean) ** 2, axis=-1, keepdims=True)
    inv = jax.lax.rsqrt(var + eps)                              # EUP, ~free
    normed = (x - mean) * inv * g_ref[...] + b_ref[...]

    # Sublayer: Linear(D, D) on the MXU, f32 accumulation.
    sub = jnp.dot(normed, w_ref[...],
                  preferred_element_type=jnp.float32) + wb_ref[...]

    if apply_dropout:
        # Inverted dropout: drop iff bits < p * 2^32  (integer threshold compare,
        # no float conversion of the random bits).
        threshold = jnp.uint32(min(int(round(p * (2 ** 32))), 2 ** 32 - 1))
        keep = rnd_ref[...] >= threshold
        sub = jnp.where(keep, sub * (1.0 / (1.0 - p)), 0.0)

    o_ref[...] = (x + sub).astype(o_ref.dtype)


# ------------------------------ python wrapper --------------------------------

def residual_connection_forward(x, gamma, beta, w, wb, *,
                                dropout_p=0.0, rng_key=None, training=True,
                                eps=1e-5, row_tile=256):
    """x: (B, S, D).  Sublayer = Linear(D, D) with weight w (D, D), bias wb (D,).

    Equivalent of `x + dropout(linear(layer_norm(x)))`.
    """
    B, S, D = x.shape
    R = B * S
    x2 = x.reshape(R, D)

    apply_dropout = bool(training) and float(dropout_p) > 0.0
    if apply_dropout:
        if rng_key is None:
            rng_key = jax.random.PRNGKey(0)
        rnd = jax.random.bits(rng_key, (R, D), dtype=jnp.uint32)
    else:
        # Unused (static branch inside the kernel), but keeps a single kernel path.
        rnd = jnp.zeros((R, D), dtype=jnp.uint32)

    # Row tile: multiple of 8 (sublane), sized for the smallest-VMEM generation
    # (v7x, 64 MiB).  On v5e/v6e 512-1024 rows per tile is better.
    TR = min(row_tile, R)
    TR = max(8, (TR // 8) * 8)
    grid = (pl.cdiv(R, TR),)

    out2 = pl.pallas_call(
        functools.partial(_fused_residual_kernel,
                          eps=float(eps), p=float(dropout_p),
                          apply_dropout=apply_dropout),
        out_shape=jax.ShapeDtypeStruct((R, D), x.dtype),
        grid=grid,
        in_specs=[
            pl.BlockSpec((TR, D), lambda i: (i, 0)),   # x tile (read once, reused for residual)
            pl.BlockSpec((1, D), lambda i: (0, 0)),    # gamma  (resident)
            pl.BlockSpec((1, D), lambda i: (0, 0)),    # beta   (resident)
            pl.BlockSpec((D, D), lambda i: (0, 0)),    # weight (resident)
            pl.BlockSpec((1, D), lambda i: (0, 0)),    # bias   (resident)
            pl.BlockSpec((TR, D), lambda i: (i, 0)),   # random bits tile
        ],
        out_specs=pl.BlockSpec((TR, D), lambda i: (i, 0)),
        compiler_params=pltpu.CompilerParams(
            dimension_semantics=("parallel",)),        # shard row tiles across TCs (v7x)
    )(x2, gamma.reshape(1, D), beta.reshape(1, D), w, wb.reshape(1, D), rnd)

    return out2.reshape(B, S, D)


# ----------------------------------- demo -------------------------------------

if __name__ == "__main__":
    key = jax.random.PRNGKey(0)
    B, S, D = 2, 8, 128                      # batch, seq, d_embed (lane-dense: 128)
    dropout_p = 0.1

    kx, kw, kb, kd = jax.random.split(key, 4)
    x = jax.random.normal(kx, (B, S, D), dtype=jnp.float32)

    # nn.LayerNorm(d_embed) default init: weight=1, bias=0
    gamma = jnp.ones((D,), jnp.float32)
    beta = jnp.zeros((D,), jnp.float32)

    # Example sublayer: Linear(d_embed, d_embed)
    w = jax.random.normal(kw, (D, D), dtype=jnp.float32) * (1.0 / jnp.sqrt(D))
    wb = jax.random.normal(kb, (D,), dtype=jnp.float32) * 0.01

    # Training mode (dropout active).
    out_train = residual_connection_forward(
        x, gamma, beta, w, wb, dropout_p=dropout_p, rng_key=kd, training=True)
    jax.block_until_ready(out_train)
    assert out_train.shape == (B, S, D)

    # Eval mode (dropout disabled, like module.eval()) -> check against pure-JAX reference.
    out_eval = residual_connection_forward(
        x, gamma, beta, w, wb, dropout_p=dropout_p, rng_key=kd, training=False)
    jax.block_until_ready(out_eval)

    x2 = x.reshape(B * S, D).astype(jnp.float32)
    mu = x2.mean(-1, keepdims=True)
    var = ((x2 - mu) ** 2).mean(-1, keepdims=True)
    normed_ref = (x2 - mu) * jax.lax.rsqrt(var + 1e-5) * gamma + beta
    ref = (x2 + normed_ref @ w + wb).reshape(B, S, D)
    assert jnp.allclose(out_eval, ref, atol=1e-4, rtol=1e-4), "eval-mode mismatch vs reference"

    print("KERNEL_OK")
</pallas_src>

<mosaic_0001>
module attributes {stable_mosaic.version = 11 : i64} {
  func.func @_fused_residual_kernel(%arg0: i32, %arg1: memref<16x128xf32, #tpu.memory_space<vmem>>, %arg2: memref<1x128xf32, #tpu.memory_space<vmem>>, %arg3: memref<1x128xf32, #tpu.memory_space<vmem>>, %arg4: memref<128x128xf32, #tpu.memory_space<vmem>>, %arg5: memref<1x128xf32, #tpu.memory_space<vmem>>, %arg6: memref<16x128xi32, #tpu.memory_space<vmem>>, %arg7: memref<16x128xf32, #tpu.memory_space<vmem>>) attributes {dimension_semantics = [#tpu.dimension_semantics<parallel>], iteration_bounds = array<i64: 1>, scalar_prefetch = 0 : i64, scratch_operands = 0 : i64, tpu.core_type = #tpu.core_type<tc>, window_params = [{transform_indices = @transform_0, window_bounds = array<i64: 16, 128>}, {pipeline_mode = #tpu.pipeline_mode<synchronous>, transform_indices = @transform_1, window_bounds = array<i64: 1, 128>}, {pipeline_mode = #tpu.pipeline_mode<synchronous>, transform_indices = @transform_2, window_bounds = array<i64: 1, 128>}, {pipeline_mode = #tpu.pipeline_mode<synchronous>, transform_indices = @transform_3, window_bounds = array<i64: 128, 128>}, {pipeline_mode = #tpu.pipeline_mode<synchronous>, transform_indices = @transform_4, window_bounds = array<i64: 1, 128>}, {transform_indices = @transform_5, window_bounds = array<i64: 16, 128>}, {transform_indices = @transform_6, window_bounds = array<i64: 16, 128>}]} {
    %c0 = arith.constant 0 : index
    %c0_0 = arith.constant 0 : index
    %0 = vector.load %arg1[%c0, %c0_0] : memref<16x128xf32, #tpu.memory_space<vmem>>, vector<16x128xf32>
    %cst = arith.constant dense<0.000000e+00> : vector<16xf32>
    %1 = vector.multi_reduction <add>, %0, %cst [1] : vector<16x128xf32> to vector<16xf32>
    %2 = vector.shape_cast %1 : vector<16xf32> to vector<16x1xf32>
    %cst_1 = arith.constant 1.280000e+02 : f32
    %3 = vector.broadcast %cst_1 : f32 to vector<16x1xf32>
    %4 = arith.divf %2, %3 : vector<16x1xf32>
    %5 = vector.broadcast %4 : vector<16x1xf32> to vector<16x128xf32>
    %6 = arith.subf %0, %5 : vector<16x128xf32>
    %7 = arith.mulf %6, %6 : vector<16x128xf32>
    %cst_2 = arith.constant dense<0.000000e+00> : vector<16xf32>
    %8 = vector.multi_reduction <add>, %7, %cst_2 [1] : vector<16x128xf32> to vector<16xf32>
    %9 = vector.shape_cast %8 : vector<16xf32> to vector<16x1xf32>
    %cst_3 = arith.constant 1.280000e+02 : f32
    %10 = vector.broadcast %cst_3 : f32 to vector<16x1xf32>
    %11 = arith.divf %9, %10 : vector<16x1xf32>
    %cst_4 = arith.constant 9.99999974E-6 : f32
    %12 = vector.broadcast %cst_4 : f32 to vector<16x1xf32>
    %13 = arith.addf %11, %12 : vector<16x1xf32>
    %14 = math.rsqrt %13 : vector<16x1xf32>
    %15 = vector.broadcast %4 : vector<16x1xf32> to vector<16x128xf32>
    %16 = arith.subf %0, %15 : vector<16x128xf32>
    %17 = vector.broadcast %14 : vector<16x1xf32> to vector<16x128xf32>
    %18 = arith.mulf %16, %17 : vector<16x128xf32>
    %c0_5 = arith.constant 0 : index
    %c0_6 = arith.constant 0 : index
    %19 = vector.load %arg2[%c0_5, %c0_6] : memref<1x128xf32, #tpu.memory_space<vmem>>, vector<1x128xf32>
    %20 = vector.broadcast %19 : vector<1x128xf32> to vector<16x128xf32>
    %21 = arith.mulf %18, %20 : vector<16x128xf32>
    %c0_7 = arith.constant 0 : index
    %c0_8 = arith.constant 0 : index
    %22 = vector.load %arg3[%c0_7, %c0_8] : memref<1x128xf32, #tpu.memory_space<vmem>>, vector<1x128xf32>
    %23 = vector.broadcast %22 : vector<1x128xf32> to vector<16x128xf32>
    %24 = arith.addf %21, %23 : vector<16x128xf32>
    %c0_9 = arith.constant 0 : index
    %c0_10 = arith.constant 0 : index
    %25 = vector.load %arg4[%c0_9, %c0_10] : memref<128x128xf32, #tpu.memory_space<vmem>>, vector<128x128xf32>
    %cst_11 = arith.constant dense<0.000000e+00> : vector<16x128xf32>
    %26 = tpu.matmul %24, %25, %cst_11 {dimension_numbers = #tpu.dot_dimension_numbers<[1], [0], [0], [1], [0, 0, 1, 1], [], []>} : vector<16x128xf32>, vector<128x128xf32>, vector<16x128xf32> -> vector<16x128xf32>
    %c0_12 = arith.constant 0 : index
    %c0_13 = arith.constant 0 : index
    %27 = vector.load %arg5[%c0_12, %c0_13] : memref<1x128xf32, #tpu.memory_space<vmem>>, vector<1x128xf32>
    %28 = vector.broadcast %27 : vector<1x128xf32> to vector<16x128xf32>
    %29 = arith.addf %26, %28 : vector<16x128xf32>
    %c0_14 = arith.constant 0 : index
    %c0_15 = arith.constant 0 : index
    %30 = vector.load %arg6[%c0_14, %c0_15] : memref<16x128xi32, #tpu.memory_space<vmem>>, vector<16x128xi32>
    %c429496730_i32 = arith.constant 429496730 : i32
    %31 = vector.broadcast %c429496730_i32 : i32 to vector<16x128xi32>
    %32 = arith.cmpi uge, %30, %31 : vector<16x128xi32>
    %cst_16 = arith.constant 1.11111116 : f32
    %33 = vector.broadcast %cst_16 : f32 to vector<16x128xf32>
    %34 = arith.mulf %29, %33 : vector<16x128xf32>
    %cst_17 = arith.constant 0.000000e+00 : f32
    %35 = vector.broadcast %cst_17 : f32 to vector<16x128xf32>
    %36 = arith.select %32, %34, %35 : vector<16x128xi1>, vector<16x128xf32>
    %37 = arith.addf %0, %36 : vector<16x128xf32>
    %c0_18 = arith.constant 0 : index
    %c0_19 = arith.constant 0 : index
    %38 = vector.load %arg7[%c0_18, %c0_19] : memref<16x128xf32, #tpu.memory_space<vmem>>, vector<16x128xf32>
    tpu.vector_store %arg7[%c0_18, %c0_19], %37 {strides = array<i32>} : memref<16x128xf32, #tpu.memory_space<vmem>>, vector<16x128xf32>,
    return
  }
  func.func @transform_0(%arg0: i32) -> (i32, i32) {
    %c0_i32 = arith.constant 0 : i32
    %c0_i32_0 = arith.constant 0 : i32
    return %arg0, %c0_i32 : i32, i32
  }
  func.func @transform_1(%arg0: i32) -> (i32, i32) {
    %c0_i32 = arith.constant 0 : i32
    %c0_i32_0 = arith.constant 0 : i32
    %c0_i32_1 = arith.constant 0 : i32
    return %c0_i32, %c0_i32_0 : i32, i32
  }
  func.func @transform_2(%arg0: i32) -> (i32, i32) {
    %c0_i32 = arith.constant 0 : i32
    %c0_i32_0 = arith.constant 0 : i32
    %c0_i32_1 = arith.constant 0 : i32
    return %c0_i32, %c0_i32_0 : i32, i32
  }
  func.func @transform_3(%arg0: i32) -> (i32, i32) {
    %c0_i32 = arith.constant 0 : i32
    %c0_i32_0 = arith.constant 0 : i32
    %c0_i32_1 = arith.constant 0 : i32
    return %c0_i32, %c0_i32_0 : i32, i32
  }
  func.func @transform_4(%arg0: i32) -> (i32, i32) {
    %c0_i32 = arith.constant 0 : i32
    %c0_i32_0 = arith.constant 0 : i32
    %c0_i32_1 = arith.constant 0 : i32
    return %c0_i32, %c0_i32_0 : i32, i32
  }
  func.func @transform_5(%arg0: i32) -> (i32, i32) {
    %c0_i32 = arith.constant 0 : i32
    %c0_i32_0 = arith.constant 0 : i32
    return %arg0, %c0_i32 : i32, i32
  }
  func.func @transform_6(%arg0: i32) -> (i32, i32) {
    %c0_i32 = arith.constant 0 : i32
    %c0_i32_0 = arith.constant 0 : i32
    return %arg0, %c0_i32 : i32, i32
  }
}

</mosaic_0001>

<bundles_post_ra>
// kernel: tpu_custom_call.1
= control target key start
LH: loop header
LB: loop body
LE: loop exit
PB: predicated region body
PF: predicated region fallthrough
CT: control target
= control target key end

     0   :  { %11 = vsyncpa [#allocation3], 0  ;;  %s553_s0 = inlined_call_operand.hbm [shape: f32[16,128], index: 0, kind: input, shape index: {}]   ;;  %s554_s1 = inlined_call_operand.vmem [shape: f32[1,128], index: 1, kind: input, shape index: {}]   ;;  %s555_s2 = inlined_call_operand.vmem [shape: f32[1,128], index: 2, kind: input, shape index: {}]   ;;  %s556_s3 = inlined_call_operand.hbm [shape: f32[128,128], index: 3, kind: input, shape index: {}]   ;;  %s557_s4 = inlined_call_operand.hbm [shape: f32[1,128], index: 4, kind: input, shape index: {}]   ;;  %s558_s5 = inlined_call_operand.vmem [shape: u32[16,128], index: 5, kind: input, shape index: {}]   ;;  %s559_s6 = inlined_call_operand.hbm [shape: f32[16,128], index: 6, kind: output, shape index: {}]  }
   0x1   :  { %12 = vsyncpa [#allocation6], 0 }
   0x2   :  { %13 = vsyncpa [#allocation4], 0  ;;  %s426_s21 = smov [#allocation5]   ;;  %s427_s23 = smov [#allocation2]  }
   0x3   :  { %s35_s22 = sshll.u32 %s426_s21, 4  ;;  %s19_s24 = sshll.u32 %s427_s23, 4  ;;  %s36_s22 = int_to_ptr.vmem [resolvable:$true] %s35_s22  ;;  %s467_s24 = int_to_ptr.vmem [resolvable:$true] %s19_s24 }
   0x4   :  { %s332_s27 = scalar_lea.hbm %s556_s3, 2048 }
   0x5   :  { %p333_p0 = scmp.ne.s32.totalorder %s556_s3, %s332_s27  ;;  %p336_p1 = scmp.lt.u32.totalorder %s332_s27, %s556_s3 }
   0x7   :  { %p338_p2 = pnand %p336_p1, %p333_p0 }
   0x9   :  { %341 = shalt.err (!%p338_p2)
}
   0xa   :  { %s342_s8 = scalar_lea.vmem %s36_s22, 2048  ;;  %p347_p4 = scmp.lt.s32.totalorder %s36_s22, %s36_s22 }
   0xb   :  { %p343_p3 = scmp.ne.s32.totalorder %s36_s22, %s342_s8  ;;  %p348_p5 = scmp.lt.s32.totalorder %s342_s8, %s342_s8 }
   0xd   :  { %p349_p6 = por %p348_p5, %p347_p4 }
   0xf   :  { %p350_p7 = pnand %p349_p6, %p343_p3 }
  0x11   :  { %353 = shalt.err (!%p350_p7)
}
  0x12   :  { %s428_s9 = smov 128   ;;  %s429_s10 = smov 8  }
  0x13   :  { %41 = dma.hbm_to_vmem [thread:$0]  %s556_s3, 2048, %s36_s22, [#allocation6], %s428_s9, %s428_s9, %s429_s10  }
  0x14   :  { %s354_s15 = scalar_lea.hbm %s553_s0, 256 }
  0x15   :  { %p355_p8 = scmp.ne.s32.totalorder %s553_s0, %s354_s15  ;;  %p358_p9 = scmp.lt.u32.totalorder %s354_s15, %s553_s0 }
  0x17   :  { %p360_p10 = pnand %p358_p9, %p355_p8 }
  0x19   :  { %363 = shalt.err (!%p360_p10)
}
  0x1a   :  { %s364_s20 = scalar_lea.vmem %s467_s24, 256  ;;  %p369_p12 = scmp.lt.s32.totalorder %s467_s24, %s467_s24 }
  0x1b   :  { %p365_p11 = scmp.ne.s32.totalorder %s467_s24, %s364_s20  ;;  %p370_p13 = scmp.lt.s32.totalorder %s364_s20, %s364_s20 }
  0x1d   :  { %p371_p0 = por %p370_p13, %p369_p12 }
  0x1f   :  { %p372_p1 = pnand %p371_p0, %p365_p11 }
  0x21   :  { %375 = shalt.err (!%p372_p1)
}
  0x22   :  { %25 = dma.hbm_to_vmem [thread:$0]  %s553_s0, 256, %s467_s24, [#allocation3], %s428_s9, %s428_s9, %s429_s10  }
  0x23   :  { %s430_s22 = smov [#allocation7]   ;;  %s376_s27 = scalar_lea.hbm %s557_s4, 16 }
  0x24   :  { %s48_s23 = sshll.u32 %s430_s22, 4  ;;  %p377_p2 = scmp.ne.s32.totalorder %s557_s4, %s376_s27  ;;  %s49_s23 = int_to_ptr.vmem [resolvable:$true] %s48_s23 }
  0x25   :  { %p380_p3 = scmp.lt.u32.totalorder %s376_s27, %s557_s4 }
  0x27   :  { %p382_p4 = pnand %p380_p3, %p377_p2 }
  0x29   :  { %385 = shalt.err (!%p382_p4)
}
  0x2a   :  { %s386_s8 = scalar_lea.vmem %s49_s23, 16  ;;  %s390_s0 = scalar_lea.vmem %s49_s23, 32 }
  0x2b   :  { %p387_p5 = scmp.ne.s32.totalorder %s49_s23, %s386_s8  ;;  %p391_p6 = scmp.lt.s32.totalorder %s49_s23, %s49_s23 }
  0x2c   :  { %p392_p7 = scmp.lt.s32.totalorder %s390_s0, %s386_s8 }
  0x2e   :  { %p393_p8 = por %p392_p7, %p391_p6 }
  0x30   :  { %p394_p9 = pnand %p393_p8, %p387_p5 }
  0x32   :  { %397 = shalt.err (!%p394_p9)
}
  0x33   :  { %51 = dma.hbm_to_vmem [thread:$0]  %s557_s4, 16, %s49_s23, [#allocation6]  }
  0x34   :  { %420 = dma.done.wait [#allocation3], 256  }
  0x35   :  { %421 = vsyncadd [#allocation3], 4294967040 }
  0x36   :  { %422 = dma.done.wait [#allocation6], 2064  }
  0x37   :  { %423 = vsyncadd [#allocation6], 4294965232  ;;  %v516_v0 = vld [vmem:[#allocation2] sm:$0xff]  ;;  %v519_v1 = vld [vmem:[#allocation2 + $0x8] sm:$0xff] }
  0x38   :  { %65 = vadd.xlane.f32.xlu0 %v516_v0  ;;  %v106_v2 = vld [vmem:[#allocation5] sm:$0xff]  ;;  %v107_v3 = vld [vmem:[#allocation5 + $0x8] sm:$0xff]  ;;  %v108_v4 = vld [vmem:[#allocation5 + $0x10] sm:$0xff] }
  0x39   :  { %v290_v5 = vpack.c.bf16 %v107_v3, %v106_v2  ;;  %v109_v6 = vld [vmem:[#allocation5 + $0x18] sm:$0xff]  ;;  %v110_v16 = vld [vmem:[#allocation5 + $0x20] sm:$0xff]  ;;  %v111_v17 = vld [vmem:[#allocation5 + $0x28] sm:$0xff] }
  0x3a   :  { %v294_v7 = vpack.c.bf16 %v109_v6, %v108_v4  ;;  %v298_v18 = vpack.c.bf16 %v111_v17, %v110_v16  ;;  %v112_v19 = vld [vmem:[#allocation5 + $0x30] sm:$0xff]  ;;  %v113_v20 = vld [vmem:[#allocation5 + $0x38] sm:$0xff]  ;;  %v114_v22 = vld [vmem:[#allocation5 + $0x40] sm:$0xff] }
  0x3b   :  { %291 = vmatprep.subr.bf16.mxu0 %v290_v5  ;;  %v302_v21 = vpack.c.bf16 %v113_v20, %v112_v19  ;;  %v115_v23 = vld [vmem:[#allocation5 + $0x48] sm:$0xff]  ;;  %v116_v25 = vld [vmem:[#allocation5 + $0x50] sm:$0xff]  ;;  %v117_v26 = vld [vmem:[#allocation5 + $0x58] sm:$0xff] }
  0x3c   :  { %67 = vadd.xlane.f32.xlu0 %v519_v1  ;;  %293 = vmatpush3.bf16.msra.mxu0 %v290_v5  ;;  %v306_v24 = vpack.c.bf16 %v115_v23, %v114_v22  ;;  %v118_v27 = vld [vmem:[#allocation5 + $0x60] sm:$0xff]  ;;  %v310_v28 = vpack.c.bf16 %v117_v26, %v116_v25  ;;  %v119_v29 = vld [vmem:[#allocation5 + $0x68] sm:$0xff]  ;;  %v120_v31 = vld [vmem:[#allocation5 + $0x70] sm:$0xff] }
  0x3d   :  { %295 = vmatprep.subr.bf16.mxu0 %v294_v7  ;;  %v314_v30 = vpack.c.bf16 %v119_v29, %v118_v27  ;;  %v121_v32 = vld [vmem:[#allocation5 + $0x78] sm:$0xff]  ;;  %v234_v41 = vld [vmem:[%s554_s1] ss:$0 sm:$0xff]  ;;  %v236_v50 = vld [vmem:[#allocation7] ss:$0 sm:$0xff] }
  0x3e   :  { %v318_v33 = vpack.c.bf16 %v121_v32, %v120_v31  ;;  %v235_v43 = vld [vmem:[%s555_s2] ss:$0 sm:$0xff]  ;;  %v205_v51 = vld [vmem:[%s558_s5 + $0x8] sm:$0xff]  ;;  %s431_s2 = smov [#allocation8]  }
  0x3f   :  { %v204_v53 = vld [vmem:[%s558_s5] sm:$0xff]  ;;  %vm207_vm0 = vcmp.ge.u32.totalorder %v205_v51, 429496730  ;;  %s221_s18 = sshll.u32 %s431_s2, 4  ;;  %s222_s18 = int_to_ptr.vmem [resolvable:$true] %s221_s18 }
  0x40   :  { %297 = vmatpush3.bf16.msra.mxu0 %v294_v7  ;;  %vm206_vm1 = vcmp.ge.u32.totalorder %v204_v53, 429496730  ;;  %s398_s19 = scalar_lea.vmem %s222_s18, 256  ;;  %p403_p11 = scmp.lt.s32.totalorder %s222_s18, %s222_s18 }
  0x41   :  { %299 = vmatprep.subr.bf16.mxu0 %v298_v18  ;;  %p399_p10 = scmp.ne.s32.totalorder %s222_s18, %s398_s19  ;;  %p404_p12 = scmp.lt.s32.totalorder %s398_s19, %s398_s19 }
  0x43   :  { %p405_p13 = por %p404_p12, %p403_p11 }
  0x44   :  { %301 = vmatpush3.bf16.msra.mxu0 %v298_v18 }
  0x45   :  { %303 = vmatprep.subr.bf16.mxu0 %v302_v21  ;;  %p406_p0 = pnand %p405_p13, %p399_p10 }
  0x48   :  { %305 = vmatpush3.bf16.msra.mxu0 %v302_v21 }
  0x49   :  { %307 = vmatprep.subr.bf16.mxu0 %v306_v24 }
  0x4c   :  { %309 = vmatpush3.bf16.msra.mxu0 %v306_v24 }
  0x4d   :  { %311 = vmatprep.subr.bf16.mxu0 %v310_v28 }
  0x50   :  { %313 = vmatpush3.bf16.msra.mxu0 %v310_v28 }
  0x51   :  { %315 = vmatprep.subr.bf16.mxu0 %v314_v30 }
  0x54   :  { %317 = vmatpush3.bf16.msra.mxu0 %v314_v30 }
  0x55   :  { %319 = vmatprep.subr.bf16.mxu0 %v318_v33 }
  0x58   :  { %321 = vmatpush3.bf16.msra.mxu0 %v318_v33 }
  0xc5   :  { %v66_v8 = vpop.xlane.xlu0 %65 }
  0xc6   :  { %v70_v9 = vmul.f32 0.0078125, %v66_v8 }
  0xc8   :  { %v72_v10 = vsub.f32 %v516_v0, %v70_v9 }
  0xc9   :  { %v68_v11 = vpop.xlane.xlu0 %67 }
  0xca   :  { %v71_v12 = vmul.f32 0.0078125, %v68_v11  ;;  %v74_v13 = vmul.f32 %v72_v10, %v72_v10 }
  0xcc   :  { %v73_v14 = vsub.f32 %v519_v1, %v71_v12  ;;  %76 = vadd.xlane.f32.xlu1 %v74_v13 }
  0xce   :  { %v75_v15 = vmul.f32 %v73_v14, %v73_v14 }
  0xd0   :  { %78 = vadd.xlane.f32.xlu1 %v75_v15 }
 0x159   :  { %v77_v34 = vpop.xlane.xlu1 %76 }
 0x15a   :  { %v80_v35 = vmul.f32 0.0078125, %v77_v34 }
 0x15c   :  { %v82_v36 = vadd.f32 1e-05, %v80_v35 }
 0x15d   :  { %v79_v37 = vpop.xlane.xlu1 %78 }
 0x15e   :  { %328 = vrsqrt.f32 %v82_v36  ;;  %v81_v38 = vmul.f32 0.0078125, %v79_v37 }
 0x160   :  { %v83_v39 = vadd.f32 1e-05, %v81_v38 }
 0x162   :  { %330 = vrsqrt.f32 %v83_v39 }
 0x168   :  { %v329_v40 = vpop.eup %328 }
 0x169   :  { %v86_v42 = vmul.f32 %v329_v40, %v72_v10 }
 0x16b   :  { %v95_v44 = vmul.f32 %v234_v41, %v86_v42 }
 0x16c   :  { %v331_v45 = vpop.eup %330 }
 0x16d   :  { %v87_v46 = vmul.f32 %v331_v45, %v73_v14  ;;  %v104_v47 = vadd.f32 %v235_v43, %v95_v44 }
 0x16f   :  { %v96_v48 = vmul.f32 %v234_v41, %v87_v46  ;;  %287 = vmatprep.mubr.f32.mxu0 %v104_v47 }
 0x171   :  { %v105_v49 = vadd.f32 %v235_v43, %v96_v48 }
 0x173   :  { %288 = vmatmul.mubr.f32.vlgmr.msra.gmra.mrb[0].mxu0 %v105_v49 }
 0x246   :  { %v289_v52 = vpop.f32.mrb[0].mxu0 }
 0x247   :  { %v201_v54 = vadd.f32 %v289_v52, %v236_v50  ;;  %v195_v55 = vpop.f32.mrb[1].mxu0 }
 0x248   :  { %v196_v56 = vadd.f32 %v236_v50, %v195_v55 }
 0x249   :  { %v209_v57 = vmul.f32 1.1111112, %v201_v54 }
 0x24a   :  { %v208_v58 = vmul.f32 1.1111112, %v196_v56 }
 0x24b   :  { %v211_v59 = vsel %vm207_vm0, %v209_v57, 0.0 }
 0x24c   :  { %v213_v60 = vadd.f32 %v211_v59, %v519_v1  ;;  %v210_v61 = vsel %vm206_vm1, %v208_v58, 0.0 }
 0x24d   :  { %v212_v62 = vadd.f32 %v210_v61, %v516_v0 }
 0x24e   :  { %215 = vst [vmem:[#allocation8 + $0x8] sm:$0xff] %v213_v60 }
 0x24f   :  { %214 = vst [vmem:[#allocation8] sm:$0xff] %v212_v62 }
 0x250   :  { %409 = shalt.err (!%p406_p0)
}
 0x251   :  { %s410_s3 = scalar_lea.hbm %s559_s6, 256 }
 0x252   :  { %p411_p1 = scmp.ne.s32.totalorder %s559_s6, %s410_s3  ;;  %p414_p2 = scmp.lt.u32.totalorder %s410_s3, %s559_s6 }
 0x254   :  { %p416_p3 = pnand %p414_p2, %p411_p1 }
 0x256   :  { %419 = shalt.err (!%p416_p3)
}
 0x257   :  { %227 = dma.vmem_to_hbm [thread:$0]  %s222_s18, 256, %s559_s6, [#allocation4], %s428_s9, %s428_s9, %s429_s10  }
 0x258   :  { %424 = dma.done.wait [#allocation4], 256  }
 0x259   :  { %425 = vsyncadd [#allocation4], 4294967040 }
 0x25a   :  { %231 = vsyncpa [#allocation3], 1 }
 0x25b   :  { %232 = vsyncpa [#allocation6], 1 }
 0x25c   :  { %233 = vsyncpa [#allocation4], 1 }

</bundles_post_ra>
